<compile_context>
chip_gen: v6e
topology: v6e:2x2x1
jax: 0.10.0
libtpu: 0.0.40
codegen_flags: <defaults>
</compile_context>

<pallas_src>
import math
from functools import partial

import jax
import jax.numpy as jnp
from jax.experimental import pallas as pl
from jax.experimental.pallas import tpu as pltpu

LANE = 128          # lane width: pad feature dims to multiples of this
BF16_SUBLANE = 16   # bf16 sublane packing: batch tile multiple of this
N_CHUNK = 256       # lane-chunk for ReLU / downcast of wide hidden layers


def _round_up(x, m):
    return (x + m - 1) // m * m


# ---------------------------------------------------------------------------
# Kernel
# ---------------------------------------------------------------------------
def _ffmlp_kernel(x_ref, *refs, final_relu: bool):
    """Fused (Linear -> ReLU)* chain for one batch tile.

    bf16 operands feed the MXU; accumulation is f32; ReLU runs on the f32
    accumulator.  For wide hidden layers the N dimension is processed in
    256-lane slices so the live f32 set stays bounded.
    """
    w_refs = refs[:-1]
    out_ref = refs[-1]
    num_layers = len(w_refs)
    act_dtype = x_ref.dtype

    h = x_ref[...]                                  # bf16 (tile_b, in_pad)
    for i, w_ref in enumerate(w_refs):
        last = i == num_layers - 1
        n = w_ref.shape[1]

        if last:
            acc = jnp.dot(h, w_ref[...], preferred_element_type=jnp.float32)
            if final_relu:                          # only for non-final layer groups
                acc = jnp.maximum(acc, 0.0)
            out_ref[...] = acc.astype(out_ref.dtype)
        elif n >= 2 * N_CHUNK:
            # Chunk matmul-N + ReLU + downcast: bounds the f32 accumulator to
            # (tile_b, 256) instead of (tile_b, hidden_pad).
            chunks = []
            c0 = 0
            while c0 < n:
                c1 = min(c0 + N_CHUNK, n)
                acc = jnp.dot(h, w_ref[:, c0:c1],
                              preferred_element_type=jnp.float32)
                chunks.append(jnp.maximum(acc, 0.0).astype(act_dtype))
                c0 = c1
            h = jnp.concatenate(chunks, axis=-1)
        else:
            acc = jnp.dot(h, w_ref[...], preferred_element_type=jnp.float32)
            h = jnp.maximum(acc, 0.0).astype(act_dtype)


def _build_group_call(x_p, weights_p, tile_b, out_dtype, *, final_relu,
                      single_buffer_weights, vmem_limit):
    Bp, in_pad = x_p.shape
    out_pad = weights_p[-1].shape[1]
    grid = (Bp // tile_b,)

    in_specs = [pl.BlockSpec((tile_b, in_pad), lambda i: (i, 0))]
    for w in weights_p:
        if single_buffer_weights:
            # Constant block index -> fetched once and kept resident; one buffer.
            spec = pl.BlockSpec(w.shape, lambda i: (0, 0),
                                pipeline_mode=pl.Buffered(1))
        else:
            spec = pl.BlockSpec(w.shape, lambda i: (0, 0))
        in_specs.append(spec)
    out_specs = pl.BlockSpec((tile_b, out_pad), lambda i: (i, 0))

    return pl.pallas_call(
        partial(_ffmlp_kernel, final_relu=final_relu),
        out_shape=jax.ShapeDtypeStruct((Bp, out_pad), out_dtype),
        grid_spec=pltpu.PrefetchScalarGridSpec(
            num_scalar_prefetch=0,
            grid=grid,
            in_specs=in_specs,
            out_specs=out_specs,
        ),
        compiler_params=pltpu.CompilerParams(
            dimension_semantics=("parallel",),      # batch tiles shard across TCs
            vmem_limit_bytes=int(vmem_limit),
        ),
    )(x_p, *weights_p)


# ---------------------------------------------------------------------------
# Wrapper / planning
# ---------------------------------------------------------------------------
def _vmem_capacity_bytes():
    try:
        return int(pltpu.get_tpu_info().vmem_capacity_bytes)
    except Exception:
        return 64 * 1024 * 1024     # conservative default (v7x per-TC VMEM)


def _choose_tile_b(B, requested=None):
    if requested is not None:
        return max(BF16_SUBLANE, _round_up(requested, BF16_SUBLANE))
    Bp16 = _round_up(B, BF16_SUBLANE)
    if Bp16 <= 256:
        return Bp16                 # single small tile
    if Bp16 <= 512:
        # Multiples of 256 fill the 2x256 MXU (v6e/v7x); 2 steps at Bp16==512
        # lets the parallel grid axis shard across v7x's two TensorCores.
        return 256
    # Large batch: big tiles amortize the ~0.35us per-step overhead; keep >= 2
    # grid steps so megacore sharding stays possible.
    for cand in (1024, 512, 256):
        if Bp16 % cand == 0 and Bp16 // cand >= 2:
            return cand
    return 512


def prepare_ffmlp_weights(weights, compute_dtype=jnp.bfloat16):
    """Pad feature dims to multiples of 128 and cast to the MXU dtype ONCE.

    Do this at model-setup time (via make_ffmlp) rather than per forward call:
    it is a full HBM read+write of the weight set and would otherwise sit
    un-hidden in front of every kernel launch.
    """
    dims = [weights[0].shape[0]] + [w.shape[1] for w in weights]
    dims_p = [_round_up(d, LANE) for d in dims]
    padded = []
    for li, w in enumerate(weights):
        wp = w.astype(compute_dtype)
        pr = dims_p[li] - w.shape[0]
        pc = dims_p[li + 1] - w.shape[1]
        if pr or pc:
            wp = jnp.pad(wp, ((0, pr), (0, pc)))
        padded.append(wp)
    return {"weights_p": tuple(padded), "dims": tuple(dims),
            "dims_p": tuple(dims_p), "compute_dtype": jnp.dtype(compute_dtype)}


def ffmlp_forward(x, weights=None, *, prepared=None, tile_b=None,
                  compute_dtype=jnp.bfloat16, out_dtype=None):
    """Run the fused MLP Pallas kernel.

    x:        (B, input_dim)
    weights:  list of (in_i, out_i) arrays (layer i computes h @ W_i), OR pass
              `prepared=prepare_ffmlp_weights(weights)` to skip per-call padding.
    """
    if prepared is None:
        prepared = prepare_ffmlp_weights(weights, compute_dtype)
    weights_p = prepared["weights_p"]
    dims = prepared["dims"]
    dims_p = prepared["dims_p"]
    compute_dtype = prepared["compute_dtype"]

    B, in_dim = x.shape
    assert in_dim == dims[0], "input feature dim mismatch"
    out_dim = dims[-1]
    out_dtype = jnp.dtype(x.dtype if out_dtype is None else out_dtype)

    act_isz = compute_dtype.itemsize
    out_isz = out_dtype.itemsize
    num_layers = len(weights_p)
    w_layer_bytes = [w.size * w.dtype.itemsize for w in weights_p]

    capacity = _vmem_capacity_bytes()
    budget = int(capacity * 0.88)       # ~12% headroom for compiler scratch/sems

    def group_need(layer_ids, tb, w_bufs):
        in_p = dims_p[layer_ids[0]]
        out_p = dims_p[layer_ids[-1] + 1]
        max_d = max(dims_p[layer_ids[0]: layer_ids[-1] + 2])
        o_isz = out_isz if layer_ids[-1] == num_layers - 1 else act_isz
        w_b = sum(w_layer_bytes[li] for li in layer_ids)
        return (w_bufs * w_b
                + 2 * tb * in_p * act_isz            # double-buffered x tiles
                + 2 * tb * out_p * o_isz             # double-buffered out tiles
                + 2 * tb * max_d * act_isz           # live h + concat temp (bf16)
                + tb * min(N_CHUNK, max_d) * 4)      # f32 acc chunk

    def plan(tb, w_bufs):
        groups, cur = [], []
        for li in range(num_layers):
            if cur and group_need(cur + [li], tb, w_bufs) > budget:
                groups.append(cur)
                cur = []
            cur.append(li)
            if group_need(cur, tb, w_bufs) > budget:
                return None             # a single layer does not fit at this tb
        groups.append(cur)
        return groups

    def plan_with_tile(tb, w_bufs):
        while True:
            groups = plan(tb, w_bufs)
            if groups is not None:
                return tb, groups
            if tb <= BF16_SUBLANE:
                # TODO(synk): K/N-tile a single over-VMEM layer (reduction grid
                # axis with an f32 accumulator scratch) instead of failing.
                raise RuntimeError(
                    "FFMLP layer weights exceed the VMEM budget even at the "
                    "smallest batch tile; per-layer K/N tiling not implemented.")
            tb = max(BF16_SUBLANE, tb // 2)

    def run(x_in, tb, groups, w_bufs, single_buffer):
        Bp = _round_up(B, tb)
        in_pad = dims_p[0]
        # Skip the pad/cast pass entirely when shapes already conform.
        if Bp == B and in_pad == in_dim and x_in.dtype == compute_dtype:
            h = x_in
        else:
            h = x_in.astype(compute_dtype)
            if Bp != B or in_pad != in_dim:
                h = jnp.pad(h, ((0, Bp - B), (0, in_pad - in_dim)))
        for gi, g in enumerate(groups):
            last_group = gi == len(groups) - 1
            g_out_dtype = out_dtype if last_group else compute_dtype
            g_weights = [weights_p[li] for li in g]
            need = group_need(g, tb, w_bufs)
            vmem_limit = min(budget, max(int(need * 1.2), 32 * 1024 * 1024))
            h = _build_group_call(
                h, g_weights, tb, g_out_dtype,
                final_relu=not last_group,
                single_buffer_weights=single_buffer,
                vmem_limit=vmem_limit)
        return h

    tb0 = _choose_tile_b(B, tile_b)
    tb, groups = plan_with_tile(tb0, w_bufs=1)
    try:
        out_p = run(x, tb, groups, w_bufs=1, single_buffer=True)
    except (TypeError, ValueError, NotImplementedError, pltpu.LoweringException):
        # Narrow fallback: only for Pallas versions that reject the
        # single-buffered (pl.Buffered(1)) weight pipeline mode.
        tb, groups = plan_with_tile(tb0, w_bufs=2)
        out_p = run(x, tb, groups, w_bufs=2, single_buffer=False)

    return out_p[:B, :out_dim]


def make_ffmlp(weights, *, compute_dtype=jnp.bfloat16, tile_b=None,
               out_dtype=None):
    """Prepare (pad + cast) the weights once; return a fast forward callable."""
    prepared = prepare_ffmlp_weights(weights, compute_dtype)

    def fwd(x):
        return ffmlp_forward(x, prepared=prepared, tile_b=tile_b,
                             compute_dtype=compute_dtype, out_dtype=out_dtype)
    return fwd


# ---------------------------------------------------------------------------
# Weight init + references
# ---------------------------------------------------------------------------
def make_ffmlp_weights(key, input_dim, output_dim, hidden_dim, num_layers,
                       std=-1.0):
    """Uniform(-std, std) init, mirroring py_FFMLP.reset_parameters."""
    if std < 0.0:
        std = math.sqrt(3.0 / hidden_dim)
    weights = []
    for i in range(num_layers):
        if i == 0:
            _in, _out = input_dim, hidden_dim
        elif i == num_layers - 1:
            _in, _out = hidden_dim, output_dim
        else:
            _in, _out = hidden_dim, hidden_dim
        key, sub = jax.random.split(key)
        # stored as (in, out); equivalent to torch weight (out, in) transposed
        w = jax.random.uniform(sub, (_in, _out), jnp.float32,
                               minval=-std, maxval=std)
        weights.append(w)
    return weights


def ffmlp_reference_f32(x, weights):
    h = x.astype(jnp.float32)
    for i, w in enumerate(weights):
        h = h @ w.astype(jnp.float32)
        if i < len(weights) - 1:
            h = jnp.maximum(h, 0.0)
    return h.astype(x.dtype)


def ffmlp_reference_bf16(x, weights):
    """Emulates kernel numerics: bf16 operands, f32 accumulation per layer."""
    h = x.astype(jnp.bfloat16)
    for i, w in enumerate(weights):
        h = jnp.dot(h, w.astype(jnp.bfloat16), preferred_element_type=jnp.float32)
        if i < len(weights) - 1:
            h = jnp.maximum(h, 0.0).astype(jnp.bfloat16)
    return h.astype(x.dtype)


if __name__ == "__main__":
    key = jax.random.PRNGKey(0)

    # --- check 1: small shapes consistent with the module's forward (B, C) ---
    B, input_dim, hidden_dim, output_dim, num_layers = 8, 8, 32, 8, 3
    key, kx, kw = jax.random.split(key, 3)
    x = jax.random.normal(kx, (B, input_dim), jnp.float32)
    weights = make_ffmlp_weights(kw, input_dim, output_dim, hidden_dim, num_layers)

    fwd = make_ffmlp(weights)            # weights padded/cast once, not per call
    out = jax.block_until_ready(fwd(x))
    assert out.shape == (B, output_dim)
    ref_bf16 = ffmlp_reference_bf16(x, weights)   # same-numerics reference
    ref_f32 = ffmlp_reference_f32(x, weights)     # module (f32) semantics
    assert jnp.allclose(out, ref_bf16, atol=1e-2, rtol=1e-2), "mismatch vs bf16 ref"
    assert jnp.allclose(out, ref_f32, atol=5e-2, rtol=5e-2), "mismatch vs f32 ref"

    # --- check 2: exercises batch tiling (grid > 1), feature padding and the
    #     chunked ReLU/downcast path for wide hidden layers ---
    B2, in2, hid2, out2_dim, nl2 = 384, 24, 640, 10, 4
    key, kx2, kw2 = jax.random.split(key, 3)
    x2 = jax.random.normal(kx2, (B2, in2), jnp.float32)
    weights2 = make_ffmlp_weights(kw2, in2, out2_dim, hid2, nl2)

    out2 = jax.block_until_ready(make_ffmlp(weights2)(x2))
    assert out2.shape == (B2, out2_dim)
    ref2_bf16 = ffmlp_reference_bf16(x2, weights2)
    assert jnp.allclose(out2, ref2_bf16, atol=5e-2, rtol=5e-2), "mismatch vs bf16 ref (2)"

    print("KERNEL_OK")
</pallas_src>

<mosaic_0001>
module attributes {stable_mosaic.version = 11 : i64} {
  func.func @_ffmlp_kernel(%arg0: i32, %arg1: memref<16x128xbf16, #tpu.memory_space<vmem>>, %arg2: memref<128x128xbf16, #tpu.memory_space<vmem>>, %arg3: memref<128x128xbf16, #tpu.memory_space<vmem>>, %arg4: memref<128x128xbf16, #tpu.memory_space<vmem>>, %arg5: memref<16x128xf32, #tpu.memory_space<vmem>>) attributes {dimension_semantics = [#tpu.dimension_semantics<parallel>], iteration_bounds = array<i64: 1>, scalar_prefetch = 0 : i64, scratch_operands = 0 : i64, tpu.core_type = #tpu.core_type<tc>, window_params = [{transform_indices = @transform_0, window_bounds = array<i64: 16, 128>}, {pipeline_mode = #tpu.pipeline_mode<synchronous>, transform_indices = @transform_1, window_bounds = array<i64: 128, 128>}, {pipeline_mode = #tpu.pipeline_mode<synchronous>, transform_indices = @transform_2, window_bounds = array<i64: 128, 128>}, {pipeline_mode = #tpu.pipeline_mode<synchronous>, transform_indices = @transform_3, window_bounds = array<i64: 128, 128>}, {transform_indices = @transform_4, window_bounds = array<i64: 16, 128>}]} {
    %c0 = arith.constant 0 : index
    %c0_0 = arith.constant 0 : index
    %0 = vector.load %arg1[%c0, %c0_0] : memref<16x128xbf16, #tpu.memory_space<vmem>>, vector<16x128xbf16>
    %c0_1 = arith.constant 0 : index
    %c0_2 = arith.constant 0 : index
    %1 = vector.load %arg2[%c0_1, %c0_2] : memref<128x128xbf16, #tpu.memory_space<vmem>>, vector<128x128xbf16>
    %cst = arith.constant dense<0.000000e+00> : vector<16x128xf32>
    %2 = tpu.matmul %0, %1, %cst {dimension_numbers = #tpu.dot_dimension_numbers<[1], [0], [0], [1], [0, 0, 1, 1], [], []>} : vector<16x128xbf16>, vector<128x128xbf16>, vector<16x128xf32> -> vector<16x128xf32>
    %cst_3 = arith.constant 0.000000e+00 : f32
    %3 = vector.broadcast %cst_3 : f32 to vector<16x128xf32>
    %4 = arith.maximumf %2, %3 : vector<16x128xf32>
    %5 = arith.truncf %4 : vector<16x128xf32> to vector<16x128xbf16>
    %c0_4 = arith.constant 0 : index
    %c0_5 = arith.constant 0 : index
    %6 = vector.load %arg3[%c0_4, %c0_5] : memref<128x128xbf16, #tpu.memory_space<vmem>>, vector<128x128xbf16>
    %cst_6 = arith.constant dense<0.000000e+00> : vector<16x128xf32>
    %7 = tpu.matmul %5, %6, %cst_6 {dimension_numbers = #tpu.dot_dimension_numbers<[1], [0], [0], [1], [0, 0, 1, 1], [], []>} : vector<16x128xbf16>, vector<128x128xbf16>, vector<16x128xf32> -> vector<16x128xf32>
    %cst_7 = arith.constant 0.000000e+00 : f32
    %8 = vector.broadcast %cst_7 : f32 to vector<16x128xf32>
    %9 = arith.maximumf %7, %8 : vector<16x128xf32>
    %10 = arith.truncf %9 : vector<16x128xf32> to vector<16x128xbf16>
    %c0_8 = arith.constant 0 : index
    %c0_9 = arith.constant 0 : index
    %11 = vector.load %arg4[%c0_8, %c0_9] : memref<128x128xbf16, #tpu.memory_space<vmem>>, vector<128x128xbf16>
    %cst_10 = arith.constant dense<0.000000e+00> : vector<16x128xf32>
    %12 = tpu.matmul %10, %11, %cst_10 {dimension_numbers = #tpu.dot_dimension_numbers<[1], [0], [0], [1], [0, 0, 1, 1], [], []>} : vector<16x128xbf16>, vector<128x128xbf16>, vector<16x128xf32> -> vector<16x128xf32>
    %c0_11 = arith.constant 0 : index
    %c0_12 = arith.constant 0 : index
    %13 = vector.load %arg5[%c0_11, %c0_12] : memref<16x128xf32, #tpu.memory_space<vmem>>, vector<16x128xf32>
    tpu.vector_store %arg5[%c0_11, %c0_12], %12 {strides = array<i32>} : memref<16x128xf32, #tpu.memory_space<vmem>>, vector<16x128xf32>,
    return
  }
  func.func @transform_0(%arg0: i32) -> (i32, i32) {
    %c0_i32 = arith.constant 0 : i32
    %c0_i32_0 = arith.constant 0 : i32
    return %arg0, %c0_i32 : i32, i32
  }
  func.func @transform_1(%arg0: i32) -> (i32, i32) {
    %c0_i32 = arith.constant 0 : i32
    %c0_i32_0 = arith.constant 0 : i32
    %c0_i32_1 = arith.constant 0 : i32
    return %c0_i32, %c0_i32_0 : i32, i32
  }
  func.func @transform_2(%arg0: i32) -> (i32, i32) {
    %c0_i32 = arith.constant 0 : i32
    %c0_i32_0 = arith.constant 0 : i32
    %c0_i32_1 = arith.constant 0 : i32
    return %c0_i32, %c0_i32_0 : i32, i32
  }
  func.func @transform_3(%arg0: i32) -> (i32, i32) {
    %c0_i32 = arith.constant 0 : i32
    %c0_i32_0 = arith.constant 0 : i32
    %c0_i32_1 = arith.constant 0 : i32
    return %c0_i32, %c0_i32_0 : i32, i32
  }
  func.func @transform_4(%arg0: i32) -> (i32, i32) {
    %c0_i32 = arith.constant 0 : i32
    %c0_i32_0 = arith.constant 0 : i32
    return %arg0, %c0_i32 : i32, i32
  }
}

</mosaic_0001>

<bundles_post_ra>
// kernel: tpu_custom_call.1
= control target key start
LH: loop header
LB: loop body
LE: loop exit
PB: predicated region body
PF: predicated region fallthrough
CT: control target
= control target key end

     0   :  { %9 = vsyncpa [#allocation3], 0  ;;  %s773_s0 = inlined_call_operand.hbm [shape: bf16[16,128], index: 0, kind: input, shape index: {}]   ;;  %s774_s1 = inlined_call_operand.hbm [shape: bf16[128,128], index: 1, kind: input, shape index: {}]   ;;  %s775_s2 = inlined_call_operand.hbm [shape: bf16[128,128], index: 2, kind: input, shape index: {}]   ;;  %s776_s3 = inlined_call_operand.hbm [shape: bf16[128,128], index: 3, kind: input, shape index: {}]   ;;  %s777_s4 = inlined_call_operand.hbm [shape: f32[16,128], index: 4, kind: output, shape index: {}]  }
   0x1   :  { %10 = vsyncpa [#allocation6], 0 }
   0x2   :  { %11 = vsyncpa [#allocation9], 0 }
   0x3   :  { %12 = vsyncpa [#allocation4], 0  ;;  %s680_s15 = smov [#allocation5]   ;;  %s681_s17 = smov [#allocation2]  }
   0x4   :  { %s30_s16 = sshll.u32 %s680_s15, 4  ;;  %s18_s18 = sshll.u32 %s681_s17, 4  ;;  %s31_s16 = int_to_ptr.vmem [resolvable:$true] %s30_s16  ;;  %s19_s18 = int_to_ptr.vmem [resolvable:$true] %s18_s18 }
   0x5   :  { %s580_s19 = scalar_lea.vmem %s31_s16, 1024  ;;  %p585_p1 = scmp.lt.s32.totalorder %s31_s16, %s31_s16 }
   0x6   :  { %p581_p0 = scmp.ne.s32.totalorder %s31_s16, %s580_s19  ;;  %p586_p2 = scmp.lt.s32.totalorder %s580_s19, %s580_s19 }
   0x8   :  { %p587_p3 = por %p586_p2, %p585_p1 }
   0xa   :  { %p588_p4 = pnand %p587_p3, %p581_p0 }
   0xc   :  { %591 = shalt.err (!%p588_p4)
}
   0xd   :  { %s682_s20 = smov 64   ;;  %s683_s21 = smov 4  }
   0xe   :  { %36 = dma.hbm_to_vmem [thread:$0]  %s774_s1, 1024, %s31_s16, [#allocation6], %s682_s20, %s682_s20, %s683_s21  }
   0xf   :  { %s600_s24 = scalar_lea.vmem %s19_s18, 128  ;;  %p605_p6 = scmp.lt.s32.totalorder %s19_s18, %s19_s18 }
  0x10   :  { %p601_p5 = scmp.ne.s32.totalorder %s19_s18, %s600_s24  ;;  %p606_p7 = scmp.lt.s32.totalorder %s600_s24, %s600_s24 }
  0x12   :  { %p607_p8 = por %p606_p7, %p605_p6 }
  0x14   :  { %p608_p9 = pnand %p607_p8, %p601_p5 }
  0x16   :  { %611 = shalt.err (!%p608_p9)
}
  0x17   :  { %24 = dma.hbm_to_vmem [thread:$0]  %s773_s0, 128, %s19_s18, [#allocation3], %s682_s20, %s682_s20, %s683_s21  }
  0x18   :  { %s684_s27 = smov [#allocation7]   ;;  %s685_s29 = smov [#allocation8]  }
  0x19   :  { %s42_s28 = sshll.u32 %s684_s27, 4  ;;  %s54_s30 = sshll.u32 %s685_s29, 4  ;;  %s43_s28 = int_to_ptr.vmem [resolvable:$true] %s42_s28  ;;  %s55_s30 = int_to_ptr.vmem [resolvable:$true] %s54_s30 }
  0x1a   :  { %s620_s1 = scalar_lea.vmem %s43_s28, 1024  ;;  %p625_p11 = scmp.lt.s32.totalorder %s43_s28, %s43_s28 }
  0x1b   :  { %p621_p10 = scmp.ne.s32.totalorder %s43_s28, %s620_s1  ;;  %p626_p12 = scmp.lt.s32.totalorder %s620_s1, %s620_s1 }
  0x1d   :  { %p627_p13 = por %p626_p12, %p625_p11 }
  0x1f   :  { %p628_p0 = pnand %p627_p13, %p621_p10 }
  0x21   :  { %631 = shalt.err (!%p628_p0)
}
  0x22   :  { %48 = dma.hbm_to_vmem [thread:$0]  %s775_s2, 1024, %s43_s28, [#allocation6], %s682_s20, %s682_s20, %s683_s21  }
  0x23   :  { %s640_s0 = scalar_lea.vmem %s55_s30, 1024  ;;  %p645_p2 = scmp.lt.s32.totalorder %s55_s30, %s55_s30 }
  0x24   :  { %p641_p1 = scmp.ne.s32.totalorder %s55_s30, %s640_s0  ;;  %p646_p3 = scmp.lt.s32.totalorder %s640_s0, %s640_s0 }
  0x26   :  { %p647_p4 = por %p646_p3, %p645_p2 }
  0x28   :  { %p648_p5 = pnand %p647_p4, %p641_p1 }
  0x2a   :  { %651 = shalt.err (!%p648_p5)
}
  0x2b   :  { %60 = dma.hbm_to_vmem [thread:$0]  %s776_s3, 1024, %s55_s30, [#allocation9], %s682_s20, %s682_s20, %s683_s21  }
  0x2c   :  { %672 = dma.done.wait [#allocation3], 128  }
  0x2d   :  { %673 = vsyncadd [#allocation3], 4294967168 }
  0x2e   :  { %674 = dma.done.wait [#allocation6], 2048  }
  0x2f   :  { %675 = vsyncadd [#allocation6], 4294965248 }
  0x30   :  { %676 = dma.done.wait [#allocation9], 1024  }
  0x31   :  { %677 = vsyncadd [#allocation9], 4294966272  ;;  %v686_v0 = vmov 0.0   ;;  %vm687_vm0 = vmmov 0   ;;  %v547_v1 = vld [vmem:[#allocation5 + $0x38] sm:$0xff]   ;;  %v548_v2 = vld [vmem:[#allocation5 + $0x30] sm:$0xff]  }
  0x32   :  { %476 = vmatprep.subr.bf16.mxu0 %v686_v0  ;;  %492 = vmatprep.mubr.msk.bf16.mxu0 %vm687_vm0, %v686_v0  ;;  %v549_v3 = vld [vmem:[#allocation5 + $0x28] sm:$0xff]   ;;  %v556_v4 = vld [vmem:[#allocation7 + $0x38] sm:$0xff]   ;;  %v550_v5 = vld [vmem:[#allocation5 + $0x20] sm:$0xff]   ;;  %s688_s2 = smov [#allocation10]  }
  0x33   :  { %496 = vmatprep.subr.bf16.mxu1 %v686_v0  ;;  %512 = vmatprep.mubr.msk.bf16.mxu1 %vm687_vm0, %v686_v0  ;;  %v557_v6 = vld [vmem:[#allocation7 + $0x30] sm:$0xff]   ;;  %v551_v7 = vld [vmem:[#allocation5 + $0x18] sm:$0xff]   ;;  %v558_v8 = vld [vmem:[#allocation7 + $0x28] sm:$0xff]   ;;  %s410_s3 = sshll.u32 %s688_s2, 4  ;;  %s411_s3 = int_to_ptr.vmem [resolvable:$true] %s410_s3 }
  0x34   :  { %477 = vmatpush3.bf16.msra.mxu0 %v547_v1  ;;  %497 = vmatpush3.bf16.msra.mxu1 %v556_v4  ;;  %v552_v9 = vld [vmem:[#allocation5 + $0x10] sm:$0xff]   ;;  %v559_v10 = vld [vmem:[#allocation7 + $0x20] sm:$0xff]   ;;  %v553_v11 = vld [vmem:[#allocation5 + $0x8] sm:$0xff]   ;;  %s652_s9 = scalar_lea.vmem %s411_s3, 256  ;;  %p657_p7 = scmp.lt.s32.totalorder %s411_s3, %s411_s3 }
  0x35   :  { %478 = vmatprep.subr.bf16.mxu0 %v686_v0  ;;  %498 = vmatprep.subr.bf16.mxu1 %v686_v0  ;;  %v560_v12 = vld [vmem:[#allocation7 + $0x18] sm:$0xff]   ;;  %v554_v13 = vld [vmem:[#allocation5] sm:$0xff]   ;;  %v561_v14 = vld [vmem:[#allocation7 + $0x10] sm:$0xff]   ;;  %p653_p6 = scmp.ne.s32.totalorder %s411_s3, %s652_s9  ;;  %p658_p8 = scmp.lt.s32.totalorder %s652_s9, %s652_s9 }
  0x36   :  { %v555_v15 = vld [vmem:[#allocation2] sm:$0xff]   ;;  %v562_v16 = vld [vmem:[#allocation7 + $0x8] sm:$0xff]   ;;  %v563_v17 = vld [vmem:[#allocation7] sm:$0xff]  }
  0x37   :  { %v564_v18 = vld [vmem:[#allocation8 + $0x38] sm:$0xff]   ;;  %v565_v19 = vld [vmem:[#allocation8 + $0x30] sm:$0xff]   ;;  %v566_v20 = vld [vmem:[#allocation8 + $0x28] sm:$0xff]   ;;  %p659_p9 = por %p658_p8, %p657_p7 }
  0x38   :  { %479 = vmatpush3.bf16.msra.mxu0 %v548_v2  ;;  %499 = vmatpush3.bf16.msra.mxu1 %v557_v6  ;;  %v567_v21 = vld [vmem:[#allocation8 + $0x20] sm:$0xff]   ;;  %v568_v22 = vld [vmem:[#allocation8 + $0x18] sm:$0xff]   ;;  %v569_v23 = vld [vmem:[#allocation8 + $0x10] sm:$0xff]  }
  0x39   :  { %480 = vmatprep.subr.bf16.mxu0 %v686_v0  ;;  %500 = vmatprep.subr.bf16.mxu1 %v686_v0  ;;  %v570_v31 = vld [vmem:[#allocation8 + $0x8] sm:$0xff]   ;;  %v571_v32 = vld [vmem:[#allocation8] sm:$0xff]   ;;  %p660_p10 = pnand %p659_p9, %p653_p6 }
  0x3c   :  { %481 = vmatpush3.bf16.msra.mxu0 %v549_v3  ;;  %501 = vmatpush3.bf16.msra.mxu1 %v558_v8 }
  0x3d   :  { %482 = vmatprep.subr.bf16.mxu0 %v686_v0  ;;  %502 = vmatprep.subr.bf16.mxu1 %v686_v0 }
  0x40   :  { %483 = vmatpush3.bf16.msra.mxu0 %v550_v5  ;;  %503 = vmatpush3.bf16.msra.mxu1 %v559_v10 }
  0x41   :  { %484 = vmatprep.subr.bf16.mxu0 %v686_v0  ;;  %504 = vmatprep.subr.bf16.mxu1 %v686_v0 }
  0x44   :  { %485 = vmatpush3.bf16.msra.mxu0 %v551_v7  ;;  %505 = vmatpush3.bf16.msra.mxu1 %v560_v12 }
  0x45   :  { %486 = vmatprep.subr.bf16.mxu0 %v686_v0  ;;  %506 = vmatprep.subr.bf16.mxu1 %v686_v0 }
  0x48   :  { %487 = vmatpush3.bf16.msra.mxu0 %v552_v9  ;;  %507 = vmatpush3.bf16.msra.mxu1 %v561_v14 }
  0x49   :  { %488 = vmatprep.subr.bf16.mxu0 %v686_v0  ;;  %508 = vmatprep.subr.bf16.mxu1 %v686_v0 }
  0x4c   :  { %489 = vmatpush3.bf16.msra.mxu0 %v553_v11  ;;  %509 = vmatpush3.bf16.msra.mxu1 %v562_v16 }
  0x4d   :  { %490 = vmatprep.subr.bf16.mxu0 %v686_v0  ;;  %510 = vmatprep.subr.bf16.mxu1 %v686_v0 }
  0x50   :  { %491 = vmatpush3.bf16.msra.mxu0 %v554_v13  ;;  %511 = vmatpush3.bf16.msra.mxu1 %v563_v17 }
  0x51   :  { %516 = vmatprep.subr.bf16.mxu0 %v686_v0 }
  0x53   :  { %493 = vmatmul.mubr.bf16.vlgmr.msra.gmra.mxu0 %v555_v15 }
  0x54   :  { %532 = vmatprep.mubr.msk.bf16.mxu0 %vm687_vm0, %v686_v0  ;;  %517 = vmatpush3.bf16.msra.mxu0 %v564_v18 }
  0x55   :  { %518 = vmatprep.subr.bf16.mxu0 %v686_v0 }
  0x58   :  { %519 = vmatpush3.bf16.msra.mxu0 %v565_v19 }
  0x59   :  { %520 = vmatprep.subr.bf16.mxu0 %v686_v0 }
  0x5c   :  { %521 = vmatpush3.bf16.msra.mxu0 %v566_v20 }
  0x5d   :  { %522 = vmatprep.subr.bf16.mxu0 %v686_v0 }
  0x60   :  { %523 = vmatpush3.bf16.msra.mxu0 %v567_v21 }
  0x61   :  { %524 = vmatprep.subr.bf16.mxu0 %v686_v0 }
  0x64   :  { %525 = vmatpush3.bf16.msra.mxu0 %v568_v22 }
  0x65   :  { %526 = vmatprep.subr.bf16.mxu0 %v686_v0 }
  0x68   :  { %527 = vmatpush3.bf16.msra.mxu0 %v569_v23 }
  0x69   :  { %528 = vmatprep.subr.bf16.mxu0 %v686_v0 }
  0x6c   :  { %529 = vmatpush3.bf16.msra.mxu0 %v570_v31 }
  0x6d   :  { %530 = vmatprep.subr.bf16.mxu0 %v686_v0 }
  0x70   :  { %531 = vmatpush3.bf16.msra.mxu0 %v571_v32 }
 0x113   :  { %v180_v24 = vpop.f32.mrf.mxu0 }
 0x114   :  { %v187_v27 = vmax.f32 %v180_v24, 0.0 }
 0x115   :  { %v494_v25 = vpop.f32.mrf.mxu0 }
 0x117   :  { %v183_v26 = vpop.f32.mrf.mxu0 }
 0x118   :  { %v188_v28 = vmax.f32 %v183_v26, 0.0 }
 0x119   :  { %v495_v29 = vpop.f32.mrf.mxu0 }
 0x11a   :  { %v189_v30 = vpack.c.bf16 %v188_v28, %v187_v27 }
 0x11c   :  { %513 = vmatmul.mubr.bf16.vlgmr.msra.gmra.mxu1 %v189_v30 }
 0x1dc   :  { %v288_v33 = vpop.f32.mrf.mxu1 }
 0x1dd   :  { %v295_v36 = vmax.f32 %v288_v33, 0.0 }
 0x1de   :  { %v514_v34 = vpop.f32.mrf.mxu1 }
 0x1e0   :  { %v291_v35 = vpop.f32.mrf.mxu1 }
 0x1e1   :  { %v296_v37 = vmax.f32 %v291_v35, 0.0 }
 0x1e2   :  { %v515_v38 = vpop.f32.mrf.mxu1 }
 0x1e3   :  { %v297_v39 = vpack.c.bf16 %v296_v37, %v295_v36 }
 0x1e5   :  { %533 = vmatmul.mubr.bf16.vlgmr.msra.gmra.mxu0 %v297_v39 }
 0x2a5   :  { %v396_v40 = vpop.f32.mrf.mxu0 }
 0x2a6   :  { %403 = vst [vmem:[#allocation10] sm:$0xff] %v396_v40 }
 0x2a7   :  { %v534_v41 = vpop.f32.mrf.mxu0 }
 0x2a9   :  { %v399_v42 = vpop.f32.mrf.mxu0 }
 0x2aa   :  { %404 = vst [vmem:[#allocation10 + $0x8] sm:$0xff] %v399_v42 }
 0x2ab   :  { %v535_v43 = vpop.f32.mrf.mxu0 }
 0x2ac   :  { %663 = shalt.err (!%p660_p10)
}
 0x2ad   :  { %s689_s10 = smov 128   ;;  %s690_s11 = smov 8  }
 0x2ae   :  { %416 = dma.vmem_to_hbm [thread:$0]  %s411_s3, 256, %s777_s4, [#allocation4], %s689_s10, %s689_s10, %s690_s11  }
 0x2af   :  { %678 = dma.done.wait [#allocation4], 256  }
 0x2b0   :  { %679 = vsyncadd [#allocation4], 4294967040 }
 0x2b1   :  { %420 = vsyncpa [#allocation3], 1 }
 0x2b2   :  { %421 = vsyncpa [#allocation6], 1 }
 0x2b3   :  { %422 = vsyncpa [#allocation9], 1 }
 0x2b4   :  { %423 = vsyncpa [#allocation4], 1 }

</bundles_post_ra>
